<compile_context>
chip_gen: v7x
topology: tpu7x:2x2x1
jax: 0.10.0
libtpu: 0.0.40
codegen_flags: <defaults>
</compile_context>

<pallas_src>
import jax
import jax.numpy as jnp
from jax.experimental import pallas as pl
from jax.experimental.pallas import tpu as pltpu

HIDDEN = 256                  # conv1 out_channels in the reference module
MAX_TB = 4096                 # max batch-tile rows (live VMEM ~10 MiB at 4096)
MATMUL_DTYPE = jnp.bfloat16   # MXU operand dtype (always f32 accumulation)


def _round_up(x, m):
    return (x + m - 1) // m * m


def _choose_tb(batch):
    """Batch-tile rows.

    Small batches run in a single grid step.  For batch > 128 we force >= 2
    grid steps (so both v7x TensorCores get work) and round the tile to a
    multiple of 128, capped at MAX_TB so per-step HBM traffic amortizes the
    ~0.35 us grid-step overhead while double-buffered tiles stay far inside
    every generation's VMEM.
    """
    if batch <= 128:
        return _round_up(batch, 8)
    n_steps = max(2, pl.cdiv(batch, MAX_TB))
    return min(MAX_TB, _round_up(pl.cdiv(batch, n_steps), 128))


def net_kernel(x_ref, w1_ref, b1_ref, w2_ref, b2_ref, o_ref):
    # x_ref:  (TB, K)        f32   (K = in_channels, unpadded)
    # w1_ref: (K, HIDDEN)    bf16  resident across the batch grid
    # b1_ref: (1, HIDDEN)    f32
    # w2_ref: (HIDDEN, N)    bf16  resident (N = out_channels, unpadded)
    # b2_ref: (1, N)         f32
    # o_ref:  (TB, N)        f32   written directly -- no lane padding
    x = x_ref[...].astype(w1_ref.dtype)
    h = jnp.dot(x, w1_ref[...], preferred_element_type=jnp.float32)
    h = jnp.maximum(h + b1_ref[...], 0.0)              # conv(=matmul)+bias+ReLU
    y = jnp.dot(h.astype(w2_ref.dtype), w2_ref[...],
                preferred_element_type=jnp.float32)
    o_ref[...] = y + b2_ref[...]


def prepare_params(conv_w, conv_b, fc_w, fc_b):
    """One-time weight preprocessing (hoisted out of the per-call hot path).

    The PyTorch x.view(B, C//16, 4, 4) is a row-major reshape, so flattening
    the conv weight row-major turns the 4x4 'valid' conv over a 4x4 input into
    a dense matmul with the identical contraction order.
    """
    hidden, cin16, kh, kw = conv_w.shape
    in_channels = cin16 * kh * kw
    w1 = conv_w.reshape(hidden, in_channels).T.astype(MATMUL_DTYPE)  # (K, HIDDEN)
    b1 = conv_b.reshape(1, hidden).astype(jnp.float32)               # (1, HIDDEN)
    w2 = fc_w.T.astype(MATMUL_DTYPE)                                 # (HIDDEN, N)
    b2 = fc_b.reshape(1, -1).astype(jnp.float32)                     # (1, N)
    return w1, b1, w2, b2


@jax.jit
def net_forward(x, w1, b1, w2, b2):
    """x: (B, in_channels) f32; params from prepare_params(). Returns (B, N) f32."""
    B, K = x.shape
    k_w, hidden = w1.shape
    n_out = w2.shape[1]
    assert k_w == K and hidden == HIDDEN

    # Batch tiling: weights stay VMEM-resident; x / out tiles are pipelined and
    # the batch axis shards across TensorCores on megacore parts.  No batch
    # padding: the grid over-covers B and out-of-bounds rows of the partial
    # last tile are masked on store (rows are independent).
    tb = _choose_tb(B)
    grid = (pl.cdiv(B, tb),)

    flops = 2 * B * (K * hidden + hidden * n_out)
    bytes_accessed = (x.size * 4
                      + w1.size * w1.dtype.itemsize
                      + w2.size * w2.dtype.itemsize
                      + b1.size * 4 + b2.size * 4
                      + B * n_out * 4)

    return pl.pallas_call(
        net_kernel,
        out_shape=jax.ShapeDtypeStruct((B, n_out), jnp.float32),
        grid_spec=pltpu.PrefetchScalarGridSpec(
            num_scalar_prefetch=0,
            grid=grid,
            in_specs=[
                pl.BlockSpec((tb, K), lambda i: (i, 0)),          # x tile
                pl.BlockSpec((K, hidden), lambda i: (0, 0)),      # w1 resident
                pl.BlockSpec((1, hidden), lambda i: (0, 0)),      # b1 resident
                pl.BlockSpec((hidden, n_out), lambda i: (0, 0)),  # w2 resident
                pl.BlockSpec((1, n_out), lambda i: (0, 0)),       # b2 resident
            ],
            out_specs=pl.BlockSpec((tb, n_out), lambda i: (i, 0)),
        ),
        compiler_params=pltpu.CompilerParams(
            dimension_semantics=("parallel",),
            vmem_limit_bytes=32 * 1024 * 1024),
        cost_estimate=pl.CostEstimate(
            flops=flops, transcendentals=0, bytes_accessed=bytes_accessed),
    )(x, w1, b1, w2, b2)


if __name__ == "__main__":
    # Shapes consistent with the module: in_channels divisible by 16
    # (the view to (B, C//16, 4, 4)).
    B = 8
    in_channels = 64          # conv1 input is (B, 4, 4, 4)
    out_channels = 32

    key = jax.random.PRNGKey(0)
    kx, kw1, kb1, kw2, kb2 = jax.random.split(key, 5)

    x = jax.random.normal(kx, (B, in_channels), dtype=jnp.float32)
    conv_w = 0.05 * jax.random.normal(kw1, (HIDDEN, in_channels // 16, 4, 4),
                                      dtype=jnp.float32)
    conv_b = 0.05 * jax.random.normal(kb1, (HIDDEN,), dtype=jnp.float32)
    fc_w = 0.05 * jax.random.normal(kw2, (out_channels, HIDDEN), dtype=jnp.float32)
    fc_b = 0.05 * jax.random.normal(kb2, (out_channels,), dtype=jnp.float32)

    # One-time param prep (outside the hot path), then the fused forward.
    w1, b1, w2, b2 = prepare_params(conv_w, conv_b, fc_w, fc_b)
    out = net_forward(x, w1, b1, w2, b2)
    jax.block_until_ready(out)

    # Pure-JAX f32 reference (same math as the PyTorch module).
    h_ref = jnp.maximum(x @ conv_w.reshape(HIDDEN, in_channels).T + conv_b, 0.0)
    ref = h_ref @ fc_w.T + fc_b
    assert out.shape == (B, out_channels)
    # bf16 matmul operands with f32 accumulation -> loosened tolerance.
    assert jnp.allclose(out, ref, atol=2e-2, rtol=2e-2), \
        float(jnp.max(jnp.abs(out - ref)))

    print("KERNEL_OK")
</pallas_src>

<mosaic_0001>
module attributes {stable_mosaic.version = 11 : i64} {
  func.func @net_kernel(%arg0: i32, %arg1: memref<8x64xf32, #tpu.memory_space<vmem>>, %arg2: memref<64x256xbf16, #tpu.memory_space<vmem>>, %arg3: memref<1x256xf32, #tpu.memory_space<vmem>>, %arg4: memref<256x32xbf16, #tpu.memory_space<vmem>>, %arg5: memref<1x32xf32, #tpu.memory_space<vmem>>, %arg6: memref<8x32xf32, #tpu.memory_space<vmem>>) attributes {dimension_semantics = [#tpu.dimension_semantics<parallel>], iteration_bounds = array<i64: 1>, scalar_prefetch = 0 : i64, scratch_operands = 0 : i64, tpu.core_type = #tpu.core_type<tc>, window_params = [{transform_indices = @transform_0, window_bounds = array<i64: 8, 64>}, {pipeline_mode = #tpu.pipeline_mode<synchronous>, transform_indices = @transform_1, window_bounds = array<i64: 64, 256>}, {pipeline_mode = #tpu.pipeline_mode<synchronous>, transform_indices = @transform_2, window_bounds = array<i64: 1, 256>}, {pipeline_mode = #tpu.pipeline_mode<synchronous>, transform_indices = @transform_3, window_bounds = array<i64: 256, 32>}, {pipeline_mode = #tpu.pipeline_mode<synchronous>, transform_indices = @transform_4, window_bounds = array<i64: 1, 32>}, {transform_indices = @transform_5, window_bounds = array<i64: 8, 32>}]} {
    %c0 = arith.constant 0 : index
    %c0_0 = arith.constant 0 : index
    %0 = vector.load %arg1[%c0, %c0_0] : memref<8x64xf32, #tpu.memory_space<vmem>>, vector<8x64xf32>
    %1 = arith.truncf %0 : vector<8x64xf32> to vector<8x64xbf16>
    %c0_1 = arith.constant 0 : index
    %c0_2 = arith.constant 0 : index
    %2 = vector.load %arg2[%c0_1, %c0_2] : memref<64x256xbf16, #tpu.memory_space<vmem>>, vector<64x256xbf16>
    %cst = arith.constant dense<0.000000e+00> : vector<8x256xf32>
    %3 = tpu.matmul %1, %2, %cst {dimension_numbers = #tpu.dot_dimension_numbers<[1], [0], [0], [1], [0, 0, 1, 1], [], []>} : vector<8x64xbf16>, vector<64x256xbf16>, vector<8x256xf32> -> vector<8x256xf32>
    %c0_3 = arith.constant 0 : index
    %c0_4 = arith.constant 0 : index
    %4 = vector.load %arg3[%c0_3, %c0_4] : memref<1x256xf32, #tpu.memory_space<vmem>>, vector<1x256xf32>
    %5 = vector.broadcast %4 : vector<1x256xf32> to vector<8x256xf32>
    %6 = arith.addf %3, %5 : vector<8x256xf32>
    %cst_5 = arith.constant 0.000000e+00 : f32
    %7 = vector.broadcast %cst_5 : f32 to vector<8x256xf32>
    %8 = arith.maximumf %6, %7 : vector<8x256xf32>
    %9 = arith.truncf %8 : vector<8x256xf32> to vector<8x256xbf16>
    %c0_6 = arith.constant 0 : index
    %c0_7 = arith.constant 0 : index
    %10 = vector.load %arg4[%c0_6, %c0_7] : memref<256x32xbf16, #tpu.memory_space<vmem>>, vector<256x32xbf16>
    %cst_8 = arith.constant dense<0.000000e+00> : vector<8x32xf32>
    %11 = tpu.matmul %9, %10, %cst_8 {dimension_numbers = #tpu.dot_dimension_numbers<[1], [0], [0], [1], [0, 0, 1, 1], [], []>} : vector<8x256xbf16>, vector<256x32xbf16>, vector<8x32xf32> -> vector<8x32xf32>
    %c0_9 = arith.constant 0 : index
    %c0_10 = arith.constant 0 : index
    %12 = vector.load %arg5[%c0_9, %c0_10] : memref<1x32xf32, #tpu.memory_space<vmem>>, vector<1x32xf32>
    %13 = vector.broadcast %12 : vector<1x32xf32> to vector<8x32xf32>
    %14 = arith.addf %11, %13 : vector<8x32xf32>
    %c0_11 = arith.constant 0 : index
    %c0_12 = arith.constant 0 : index
    %15 = vector.load %arg6[%c0_11, %c0_12] : memref<8x32xf32, #tpu.memory_space<vmem>>, vector<8x32xf32>
    tpu.vector_store %arg6[%c0_11, %c0_12], %14 {strides = array<i32>} : memref<8x32xf32, #tpu.memory_space<vmem>>, vector<8x32xf32>,
    return
  }
  func.func @transform_0(%arg0: i32) -> (i32, i32) {
    %c0_i32 = arith.constant 0 : i32
    %c0_i32_0 = arith.constant 0 : i32
    return %arg0, %c0_i32 : i32, i32
  }
  func.func @transform_1(%arg0: i32) -> (i32, i32) {
    %c0_i32 = arith.constant 0 : i32
    %c0_i32_0 = arith.constant 0 : i32
    %c0_i32_1 = arith.constant 0 : i32
    return %c0_i32, %c0_i32_0 : i32, i32
  }
  func.func @transform_2(%arg0: i32) -> (i32, i32) {
    %c0_i32 = arith.constant 0 : i32
    %c0_i32_0 = arith.constant 0 : i32
    %c0_i32_1 = arith.constant 0 : i32
    return %c0_i32, %c0_i32_0 : i32, i32
  }
  func.func @transform_3(%arg0: i32) -> (i32, i32) {
    %c0_i32 = arith.constant 0 : i32
    %c0_i32_0 = arith.constant 0 : i32
    %c0_i32_1 = arith.constant 0 : i32
    return %c0_i32, %c0_i32_0 : i32, i32
  }
  func.func @transform_4(%arg0: i32) -> (i32, i32) {
    %c0_i32 = arith.constant 0 : i32
    %c0_i32_0 = arith.constant 0 : i32
    %c0_i32_1 = arith.constant 0 : i32
    return %c0_i32, %c0_i32_0 : i32, i32
  }
  func.func @transform_5(%arg0: i32) -> (i32, i32) {
    %c0_i32 = arith.constant 0 : i32
    %c0_i32_0 = arith.constant 0 : i32
    return %arg0, %c0_i32 : i32, i32
  }
}

</mosaic_0001>

<bundles_post_ra>
// kernel: net_forward.1
= control target key start
LH: loop header
LB: loop body
LE: loop exit
PB: predicated region body
PF: predicated region fallthrough
CT: control target
= control target key end

     0   :  { %v426_v2 = vmov 0   ;;  %vm84_vm0 = vcmask 523264   ;;  %s551_s0 = inlined_call_operand.vmem [shape: f32[8,64], index: 0, kind: input, shape index: {}]   ;;  %s552_s1 = inlined_call_operand.vmem [shape: bf16[64,256], index: 1, kind: input, shape index: {}]   ;;  %s553_s2 = inlined_call_operand.vmem [shape: f32[1,256], index: 2, kind: input, shape index: {}]   ;;  %s554_s3 = inlined_call_operand.vmem [shape: bf16[256,32], index: 3, kind: input, shape index: {}]   ;;  %s555_s4 = inlined_call_operand.vmem [shape: f32[1,32], index: 4, kind: input, shape index: {}]   ;;  %s556_s5 = inlined_call_operand.hbm [shape: f32[8,32], index: 5, kind: output, shape index: {}]  }
   0x1   :  { %v374_v0 = vld [vmem:[%s552_s1 + $0x4] ss:$8 sps:$4 sm:$0xff]   ;;  %v376_v1 = vld [vmem:[%s552_s1] ss:$8 sps:$4 sm:$0xff]   ;;  %120 = vmatprep.mubr.bf16.mxu0 %v426_v2  ;;  %v377_v3 = vld [vmem:[%s552_s1 + $0x14] ss:$8 sps:$4 sm:$0xff]  }
   0x2   :  { %88 = vmatprep.subr.bf16.mxu0 %v374_v0  ;;  %v379_v4 = vld [vmem:[%s552_s1 + $0x10] ss:$8 sps:$4 sm:$0xff]   ;;  %v380_v5 = vld [vmem:[%s552_s1 + $0x24] ss:$8 sps:$4 sm:$0xff]   ;;  %v382_v6 = vld [vmem:[%s552_s1 + $0x20] ss:$8 sps:$4 sm:$0xff]  }
   0x3   :  { %89 = vmatpush1.bf16.msra.mxu0 %v376_v1  ;;  %v383_v7 = vld [vmem:[%s552_s1 + $0x34] ss:$8 sps:$4 sm:$0xff]   ;;  %v386_v8 = vld [vmem:[%s554_s3 + $0x40] sm:$0xff]   ;;  %v388_v10 = vld [vmem:[%s554_s3 + $0x48] sm:$0xff]  }
   0x4   :  { %90 = vmatprep.subr.bf16.mxu0 %v377_v3  ;;  %v387_v9 = vld [vmem:[%s554_s3] sm:$0xff]   ;;  %350 = vmatprep.subr.bf16.mxu1 %v386_v8  ;;  %v385_v11 = vld [vmem:[%s552_s1 + $0x30] ss:$8 sps:$4 sm:$0xff]   ;;  %v389_v12 = vld [vmem:[%s554_s3 + $0x8] sm:$0xff]  }
   0x5   :  { %351 = vmatpush3.bf16.msra.mxu1 %v387_v9  ;;  %v390_v13 = vld [vmem:[%s554_s3 + $0x50] sm:$0xff]   ;;  %v22_v14 = vld [vmem:[%s551_s0] sm:$0xff]  ;;  %v392_v17 = vld [vmem:[%s554_s3 + $0x58] sm:$0xff]  }
   0x6   :  { %352 = vmatprep.subr.bf16.mxu1 %v388_v10  ;;  %v391_v15 = vld [vmem:[%s554_s3 + $0x10] sm:$0xff]   ;;  %v23_v16 = vpack.c.bf16 %v22_v14, %v22_v14  ;;  %v393_v18 = vld [vmem:[%s554_s3 + $0x18] sm:$0xff]   ;;  %v394_v19 = vld [vmem:[%s554_s3 + $0x60] sm:$0xff]  }
   0x7   :  { %91 = vmatpush1.bf16.msra.mxu0 %v379_v4 }
   0x8   :  { %92 = vmatprep.subr.bf16.mxu0 %v380_v5 }
   0x9   :  { %353 = vmatpush3.bf16.msra.mxu1 %v389_v12 }
   0xa   :  { %354 = vmatprep.subr.bf16.mxu1 %v390_v13 }
   0xb   :  { %93 = vmatpush1.bf16.msra.mxu0 %v382_v6 }
   0xc   :  { %94 = vmatprep.subr.bf16.mxu0 %v383_v7 }
   0xd   :  { %355 = vmatpush3.bf16.msra.mxu1 %v391_v15 }
   0xe   :  { %356 = vmatprep.subr.bf16.mxu1 %v392_v17 }
   0xf   :  { %95 = vmatpush1.bf16.msra.mxu0 %v385_v11 }
  0x12   :  { %332 = vmatmul.mubr.msk.bf16.vlgmr.msra.gmra.mrb[0].mxu0 %vm84_vm0, %v23_v16 }
  0x13   :  { %10 = vsyncpa [#allocation3], 0  ;;  %357 = vmatpush3.bf16.msra.mxu1 %v393_v18  ;;  %v395_v20 = vld [vmem:[%s554_s3 + $0x20] sm:$0xff]   ;;  %v396_v21 = vld [vmem:[%s554_s3 + $0x68] sm:$0xff]   ;;  %v34_v27 = vlaneseq  ;;  %vm308_vm1 = vcmask 261120  }
  0x14   :  { %358 = vmatprep.subr.bf16.mxu1 %v394_v19  ;;  %v397_v22 = vld [vmem:[%s554_s3 + $0x28] sm:$0xff]   ;;  %v398_v23 = vld [vmem:[%s554_s3 + $0x70] sm:$0xff]   ;;  %v400_v25 = vld [vmem:[%s554_s3 + $0x78] sm:$0xff]  }
  0x15   :  { %v399_v24 = vld [vmem:[%s554_s3 + $0x30] sm:$0xff]   ;;  %v401_v26 = vld [vmem:[%s554_s3 + $0x38] sm:$0xff]   ;;  %v35_v28 = vshrl.u32 %v34_v27, 7  ;;  %v32_v30 = vld [vmem:[%s553_s2] sm:$0x3]  ;;  %s427_s2 = smov [#allocation2]  }
  0x16   :  { %v333_v45 = vld [vmem:[%s555_s4] ss:$0 sm:$0xff]  ;;  %s316_s19 = sshll.u32 %s427_s2, 4  ;;  %s317_s19 = int_to_ptr.vmem [resolvable:$true] %s316_s19 }
  0x17   :  { %359 = vmatpush3.bf16.msra.mxu1 %v395_v20  ;;  %v36_v29 = vsub.s32 0, %v35_v28  ;;  %v40_v31 = vsub.s32 1, %v35_v28  ;;  %s402_s20 = scalar_lea.vmem %s317_s19, 128  ;;  %p407_p1 = scmp.lt.s32.totalorder %s317_s19, %s317_s19 }
  0x18   :  { %360 = vmatprep.subr.bf16.mxu1 %v396_v21  ;;  %p403_p0 = scmp.ne.s32.totalorder %s317_s19, %s402_s20  ;;  %p408_p2 = scmp.lt.s32.totalorder %s402_s20, %s402_s20 }
  0x19   :  { %v37_v32 = vrot.slane %v32_v30, %v36_v29  ;;  %v41_v33 = vrot.slane %v32_v30, %v40_v31 }
  0x1a   :  { %p409_p3 = por %p408_p2, %p407_p1 }
  0x1b   :  { %361 = vmatpush3.bf16.msra.mxu1 %v397_v22 }
  0x1c   :  { %362 = vmatprep.subr.bf16.mxu1 %v398_v23  ;;  %p410_p4 = pnand %p409_p3, %p403_p0 }
  0x1f   :  { %363 = vmatpush3.bf16.msra.mxu1 %v399_v24 }
  0x20   :  { %364 = vmatprep.subr.bf16.mxu1 %v400_v25 }
  0x23   :  { %365 = vmatpush3.bf16.msra.mxu1 %v401_v26 }
  0xe5   :  { %v122_v34 = vpop.f32.mrb[0].mxu0 }
  0xe6   :  { %v123_v35 = vadd.f32 %v122_v34, %v37_v32  ;;  %v124_v36 = vpop.f32.mrb[1].mxu0 }
  0xe7   :  { %v125_v37 = vadd.f32 %v124_v36, %v41_v33  ;;  %v126_v38 = vpop.f32.mrb[2].mxu0 }
  0xe8   :  { %v129_v39 = vmax.f32 %v123_v35, 0.0  ;;  %v127_v40 = vpop.f32.mrb[3].mxu0 }
  0xe9   :  { %v130_v41 = vmax.f32 %v125_v37, 0.0 }
  0xea   :  { %v131_v43 = vpack.c.bf16 %v129_v39, %v129_v39 }
  0xeb   :  { %v132_v42 = vpack.c.bf16 %v130_v41, %v130_v41 }
  0xed   :  { %300 = vmatprep.mubr.bf16.mxu1 %v132_v42 }
  0xee   :  { %301 = vmatmul.mubr.bf16.vlgmr.msra.gmra.mrb[0].mxu1 %v131_v43 }
 0x1c1   :  { %v366_v44 = vpop.f32.mrb[0].mxu1 }
 0x1c2   :  { %v367_v46 = vpop.f32.mrb[1].mxu1 }
 0x1c3   :  { %v368_v47 = vadd.f32 %v367_v46, %v366_v44  ;;  %v369_v48 = vpop.f32.mrb[2].mxu1 }
 0x1c4   :  { %v370_v49 = vpop.f32.mrb[3].mxu1 }
 0x1c5   :  { %v303_v50 = vadd.f32 %v368_v47, %v333_v45 }
 0x1c7   :  { %309 = vst.msk [vmem:[#allocation2] sm:$0xff] %vm308_vm1, %v303_v50 }
 0x1c8   :  { %413 = shalt.err (!%p410_p4)
}
 0x1c9   :  { %s414_s4 = scalar_lea.hbm %s556_s5, 128 }
 0x1ca   :  { %p415_p5 = scmp.ne.s32.totalorder %s556_s5, %s414_s4  ;;  %p418_p6 = scmp.lt.u32.totalorder %s414_s4, %s556_s5 }
 0x1cc   :  { %p420_p7 = pnand %p418_p6, %p415_p5 }
 0x1ce   :  { %423 = shalt.err (!%p420_p7)
}
 0x1cf   :  { %319 = dma.vmem_to_hbm [thread:$0]  %s317_s19, 128, %s556_s5, [#allocation3]  }
 0x1d0   :  { %424 = dma.done.wait [#allocation3], 128  }
 0x1d1   :  { %425 = vsyncadd [#allocation3], 4294967168 }
 0x1d2   :  { %323 = vsyncpa [#allocation3], 1 }

</bundles_post_ra>
